<compile_context>
chip_gen: v7x
topology: tpu7x:2x2x1
jax: 0.10.0
libtpu: 0.0.40
codegen_flags: <defaults>
</compile_context>

<pallas_src>
import functools

import jax
import jax.numpy as jnp
import numpy as np
from jax.experimental import pallas as pl
from jax.experimental.pallas import tpu as pltpu


def _round_up(x, m):
    return (x + m - 1) // m * m


# ----------------------------------------------------------------------------------
# Pallas kernel: bucket conv + res_scale + residual add for one (batch, row-block)
# ----------------------------------------------------------------------------------
def _bucket_conv_kernel(win_ref, fw_ref, mask_ref, bk_ref, xres_ref, out_ref, patch_ref,
                        *, K, W, TH, Cin_pad, Cout_pad, num_types, kkc_pad, res_scale):
    """Refs (per grid step):
      win_ref   : (1, 1, Cin_pad, Lin) f32  row-window of padded activations, flattened
      fw_ref    : (T*Cout_pad, kkc_pad) f32 filter table (weights, bias col, zero pad)
      mask_ref  : (K, 1, TH*W) f32          per-kw column-validity masks ('same' W pad)
      bk_ref    : (1, 1, 1, TH*W) i32       bucket id per pixel
      xres_ref  : (1, Cout_pad, TH*W) f32   residual (block input x), lane-dense
      out_ref   : (1, Cout_pad, TH*W) f32   lane-dense NCHW-flat output
      patch_ref : (kkc_pad, TH*W) f32       VMEM scratch: patch matrix, written once
    """
    L = TH * W
    p = K // 2
    n_tap_rows = K * K * Cin_pad

    xw = win_ref[0, 0]                              # (Cin_pad, Lin) f32

    # Build the patch matrix ONCE, lane-dense: row group (kh,kw) -> Cin_pad aligned
    # rows, col = output pixel.  Output pixel o = h*W + w needs window element
    # o + kh*W + kw, masked where the horizontal tap falls outside [0, W).
    for kh in range(K):
        for kw in range(K):
            s = kh * W + kw                         # static lane offset of this tap
            piece = xw[:, s:s + L]                  # (Cin_pad, L) f32
            if kw != p:                             # center-column mask is all ones
                piece = piece * mask_ref[kw]
            r0 = (kh * K + kw) * Cin_pad            # multiple of 8 -> aligned store
            patch_ref[r0:r0 + Cin_pad, :] = piece

    # Bias ones-row + zero padding rows, written as ONE aligned 8-row group.
    tail = (jax.lax.broadcasted_iota(jnp.int32, (kkc_pad - n_tap_rows, L), 0) == 0
            ).astype(jnp.float32)
    patch_ref[n_tap_rows:kkc_pad, :] = tail

    # One fused MXU matmul over ALL bucket types (bias folded in via the ones-row):
    # (T*Cout_pad, kkc_pad) @ (kkc_pad, L) -> (T*Cout_pad, L), f32 in / f32 acc.
    y = jnp.dot(fw_ref[...], patch_ref[...], preferred_element_type=jnp.float32)

    # Per-pixel bucket selection as a lane-dense masked sum (exactly one type matches
    # per pixel; out-of-range ids fall through to zero, matching the reference).
    # NOTE: for num_types >> 16 an MoE-style grouped kernel (scalar prefetch) would
    # avoid the T-fold redundant work; at T=8 compute-all-and-select is the fast choice.
    bk = bk_ref[0, 0]                               # (1, L) i32
    acc = jnp.zeros((Cout_pad, L), jnp.float32)
    for t in range(num_types):
        acc = acc + jnp.where(bk == t, y[t * Cout_pad:(t + 1) * Cout_pad, :], 0.0)

    # Fused epilogue:  out = bucket_conv * res_scale + residual  (aligned 8-row store).
    out_ref[0] = acc * res_scale + xres_ref[0]


# ----------------------------------------------------------------------------------
# Tile sizing: VMEM-budget-driven, lane-aligned, megacore-aware
# ----------------------------------------------------------------------------------
def _max_tile_pixels(Cin_pad, Cout_pad, T, K, kkc_pad,
                     budget_bytes=36 * 1024 * 1024, hard_cap=32768):
    """Largest flattened tile (pixels) whose live VMEM footprint fits the budget."""
    per_px = (2 * 4 * Cin_pad        # halo window block (f32, double-buffered)
              + 2 * 4 * K            # per-kw column masks
              + 2 * 4                # bucket ids (i32)
              + 2 * 4 * Cout_pad     # residual block
              + 2 * 4 * Cout_pad     # output block
              + 4 * kkc_pad          # patch-matrix scratch
              + 4 * T * Cout_pad     # fused matmul result
              + 2 * 4 * Cout_pad)    # select accumulator + slack
    return max(128, min(hard_cap, (budget_bytes // per_px) // 128 * 128))


def _choose_row_tile(H, W, n_batch, max_pixels):
    """Largest row tile TH dividing H with TH*W <= max_pixels and TH*W a multiple of
    128 unless the tile is the whole image; keeps >= 2 total grid steps when the batch
    is tiny (v7x megacore)."""
    divs = [d for d in range(H, 0, -1) if H % d == 0]
    cand = [th for th in divs
            if th * W <= max_pixels and (th == H or (th * W) % 128 == 0)]
    if not cand:
        aligned = [th for th in divs if (th * W) % 128 == 0]
        return min(aligned) if aligned else H
    th = cand[0]
    if n_batch * (H // th) < 2:                      # don't leave a TensorCore idle
        for th2 in cand:
            if (H // th2) >= 2 and (th2 * W) % 128 == 0:
                return th2
    return th


# ----------------------------------------------------------------------------------
# Wrapper: BucketConvLayerCUDA fused with `* res_scale + residual`
# ----------------------------------------------------------------------------------
def bucket_conv_residual(act, buckets, w_table, b_table, residual, *, res_scale=1.0,
                         row_tile=None):
    """act:(B,Cin,H,W) f32, buckets:(B,H,W) int, w_table:(T,Cout,Cin,K,K) f32,
    b_table:(T,Cout) f32, residual:(B,Cout,H,W) f32 -> (B,Cout,H,W) f32."""
    B, Cin, H, W = act.shape
    T, Cout, _, K, _ = w_table.shape
    p = K // 2
    Cin_pad = _round_up(Cin, 8)
    Cout_pad = _round_up(Cout, 8)
    n_tap_rows = K * K * Cin_pad
    kkc_pad = _round_up(n_tap_rows + 1, 8)

    if row_tile is None:
        TH = _choose_row_tile(H, W, B, _max_tile_pixels(Cin_pad, Cout_pad, T, K, kkc_pad))
    else:
        TH = row_tile
    assert H % TH == 0
    nR = H // TH
    L = TH * W
    Lin = (TH + 2 * p) * W + 2 * p

    # ---- XLA-side staging (layout plumbing only, cheap) ----
    # Channel-padded (sublane-aligned), row-padded activations cut into per-row-block
    # halo windows, flattened so each grid step sees one lane-dense (Cin_pad, Lin) slab.
    act_p = jnp.pad(act.astype(jnp.float32),
                    ((0, 0), (0, Cin_pad - Cin), (p, p), (0, 0)))
    wins = [act_p[:, :, r * TH: r * TH + TH + 2 * p, :] for r in range(nR)]
    win = jnp.stack(wins, axis=1).reshape(B, nR, Cin_pad, (TH + 2 * p) * W)
    win = jnp.pad(win, ((0, 0), (0, 0), (0, 0), (p, p)))              # (B,nR,Cp,Lin)

    # Filter table in fused-matmul layout: row (t, oc_pad); cols (kh,kw,ic_pad), bias,
    # zero pad.  Kept in f32 so the bias stays exact (MXU is far from the bottleneck).
    wt = jnp.transpose(w_table.astype(jnp.float32), (0, 1, 3, 4, 2))  # (T,Co,K,K,Ci)
    wt = jnp.pad(wt, ((0, 0), (0, Cout_pad - Cout), (0, 0), (0, 0), (0, Cin_pad - Cin)))
    wt = wt.reshape(T, Cout_pad, n_tap_rows)
    bias = jnp.pad(b_table.astype(jnp.float32),
                   ((0, 0), (0, Cout_pad - Cout)))[..., None]          # (T,Co_pad,1)
    fw = jnp.concatenate([wt, bias], axis=-1)
    fw = jnp.pad(fw, ((0, 0), (0, 0), (0, kkc_pad - n_tap_rows - 1)))
    fw = fw.reshape(T * Cout_pad, kkc_pad)

    # Per-kw column-validity masks for the horizontal 'same' padding.
    wcol = jnp.arange(L, dtype=jnp.int32) % W
    colmask = jnp.stack(
        [((wcol + kw - p >= 0) & (wcol + kw - p <= W - 1)).astype(jnp.float32)
         for kw in range(K)], axis=0).reshape(K, 1, L)

    bk = buckets.astype(jnp.int32).reshape(B, nR, 1, L)
    xres = jnp.pad(residual.astype(jnp.float32),
                   ((0, 0), (0, Cout_pad - Cout), (0, 0), (0, 0))
                   ).reshape(B, Cout_pad, H * W)

    kernel = functools.partial(
        _bucket_conv_kernel, K=K, W=W, TH=TH, Cin_pad=Cin_pad, Cout_pad=Cout_pad,
        num_types=T, kkc_pad=kkc_pad, res_scale=float(res_scale))

    out = pl.pallas_call(
        kernel,
        out_shape=jax.ShapeDtypeStruct((B, Cout_pad, H * W), jnp.float32),
        grid_spec=pltpu.PrefetchScalarGridSpec(
            num_scalar_prefetch=0,
            grid=(B, nR),
            in_specs=[
                pl.BlockSpec((1, 1, Cin_pad, Lin), lambda b, r: (b, r, 0, 0)),  # window
                pl.BlockSpec((T * Cout_pad, kkc_pad), lambda b, r: (0, 0)),     # filters
                pl.BlockSpec((K, 1, L), lambda b, r: (0, 0, 0)),                # masks
                pl.BlockSpec((1, 1, 1, L), lambda b, r: (b, r, 0, 0)),          # buckets
                pl.BlockSpec((1, Cout_pad, L), lambda b, r: (b, 0, r)),         # residual
            ],
            out_specs=pl.BlockSpec((1, Cout_pad, L), lambda b, r: (b, 0, r)),   # lane-dense
            scratch_shapes=[pltpu.VMEM((kkc_pad, L), jnp.float32)],             # patch mat
        ),
        compiler_params=pltpu.CompilerParams(
            dimension_semantics=("parallel", "parallel"),   # B and row-blocks independent
            vmem_limit_bytes=48 * 1024 * 1024),
    )(win, fw, colmask, bk, xres)

    # Output is already NCHW-ordered with flattened spatial dims: reshape + unpad only.
    return out.reshape(B, Cout_pad, H, W)[:, :Cout]


# ----------------------------------------------------------------------------------
# Full ResidualBlockBucket forward (body conv / PReLU are standard dense ops -> XLA)
# ----------------------------------------------------------------------------------
def _conv_same(x, w, b):
    y = jax.lax.conv_general_dilated(
        x, w, window_strides=(1, 1), padding="SAME",
        dimension_numbers=("NCHW", "OIHW", "NCHW"),
        precision=jax.lax.Precision.HIGHEST)
    return y + b[None, :, None, None]


def _prelu(x, a):
    return jnp.where(x >= 0, x, a * x)


def residual_block_bucket(x, buckets, params, *, res_scale, small_res=True):
    """out = BucketConv(PReLU(body(x)), buckets) * res_scale + x   (nonlinear2 unused)."""
    h = _conv_same(x, params["body_w"], params["body_b"])
    if not small_res:   # body = Conv -> PReLU -> Conv
        h = _prelu(h, params["body_prelu_a"])
        h = _conv_same(h, params["body_w2"], params["body_b2"])
    h = _prelu(h, params["prelu_a"])
    return bucket_conv_residual(h, buckets, params["w_table"], params["b_table"],
                                x, res_scale=res_scale)


def reference_forward(x, buckets, params, *, res_scale, small_res=True):
    """Pure-JAX reference: per-type 'same' conv + mask select, all f32."""
    h = _conv_same(x, params["body_w"], params["body_b"])
    if not small_res:
        h = _prelu(h, params["body_prelu_a"])
        h = _conv_same(h, params["body_w2"], params["body_b2"])
    h = _prelu(h, params["prelu_a"])
    T, Cout = params["b_table"].shape
    bc = jnp.zeros((x.shape[0], Cout, x.shape[2], x.shape[3]), jnp.float32)
    for t in range(T):
        y = _conv_same(h, params["w_table"][t], params["b_table"][t])
        bc = jnp.where((buckets == t)[:, None, :, :], y, bc)
    return bc * res_scale + x


if __name__ == "__main__":
    # Small shapes consistent with the module's forward.
    B, C, H, W, K = 2, 4, 16, 16, 3
    Qstr = Qcohe = Qangle = 2
    T = Qstr * Qcohe * Qangle          # num_types = 8
    res_scale = 0.1

    key = jax.random.PRNGKey(0)
    k1, k2, k3, k4 = jax.random.split(key, 4)

    # filter_emb.weight ~ N(0, 0.1), row length = Cout * (Cin*K*K + 1)  (bias=True).
    emb = 0.1 * jax.random.normal(k1, (T, C * (C * K * K + 1)), jnp.float32)
    emb = emb.reshape(T, C, C * K * K + 1)
    w_table = emb[..., :C * K * K].reshape(T, C, C, K, K)
    b_table = emb[..., -1]

    params = {
        "body_w": 0.1 * jax.random.normal(k2, (C, C, 3, 3), jnp.float32),
        "body_b": jnp.zeros((C,), jnp.float32),
        "prelu_a": jnp.float32(0.25),     # nn.PReLU() default init
        "w_table": w_table,
        "b_table": b_table,
    }

    x = jax.random.normal(k3, (B, C, H, W), jnp.float32)
    buckets = jax.random.randint(k4, (B, H, W), 0, T, jnp.int32)

    out = residual_block_bucket(x, buckets, params, res_scale=res_scale)
    out = jax.block_until_ready(out)

    ref = reference_forward(x, buckets, params, res_scale=res_scale)
    assert out.shape == (B, C, H, W)
    # f32 MXU operands + f32 accumulation + exact f32 bias -> tight error budget.
    np.testing.assert_allclose(np.asarray(out), np.asarray(ref), rtol=2e-3, atol=2e-3)

    print("KERNEL_OK")
</pallas_src>

<mosaic_0001>
module attributes {stable_mosaic.version = 11 : i64} {
  func.func @_bucket_conv_kernel(%arg0: i32, %arg1: i32, %arg2: memref<1x1x8x290xf32, #tpu.memory_space<vmem>>, %arg3: memref<64x80xf32, #tpu.memory_space<vmem>>, %arg4: memref<3x1x256xf32, #tpu.memory_space<vmem>>, %arg5: memref<1x1x1x256xi32, #tpu.memory_space<vmem>>, %arg6: memref<1x8x256xf32, #tpu.memory_space<vmem>>, %arg7: memref<1x8x256xf32, #tpu.memory_space<vmem>>, %arg8: memref<80x256xf32, #tpu.memory_space<vmem>>) attributes {dimension_semantics = [#tpu.dimension_semantics<parallel>, #tpu.dimension_semantics<parallel>], iteration_bounds = array<i64: 2, 1>, scalar_prefetch = 0 : i64, scratch_operands = 1 : i64, tpu.core_type = #tpu.core_type<tc>, window_params = [{transform_indices = @transform_0, window_bounds = array<i64: 1, 1, 8, 290>}, {pipeline_mode = #tpu.pipeline_mode<synchronous>, transform_indices = @transform_1, window_bounds = array<i64: 64, 80>}, {pipeline_mode = #tpu.pipeline_mode<synchronous>, transform_indices = @transform_2, window_bounds = array<i64: 3, 1, 256>}, {transform_indices = @transform_3, window_bounds = array<i64: 1, 1, 1, 256>}, {transform_indices = @transform_4, window_bounds = array<i64: 1, 8, 256>}, {transform_indices = @transform_5, window_bounds = array<i64: 1, 8, 256>}]} {
    %c0 = arith.constant 0 : index
    %c0_0 = arith.constant 0 : index
    %c0_1 = arith.constant 0 : index
    %c0_2 = arith.constant 0 : index
    %0 = vector.load %arg2[%c0, %c0_0, %c0_1, %c0_2] : memref<1x1x8x290xf32, #tpu.memory_space<vmem>>, vector<1x1x8x290xf32>
    %1 = vector.shape_cast %0 : vector<1x1x8x290xf32> to vector<8x290xf32>
    %2 = vector.extract_strided_slice %1 {offsets = [0, 0], sizes = [8, 256], strides = [1, 1]} : vector<8x290xf32> to vector<8x256xf32>
    %c0_3 = arith.constant 0 : index
    %c0_4 = arith.constant 0 : index
    %c0_5 = arith.constant 0 : index
    %3 = vector.load %arg4[%c0_3, %c0_4, %c0_5] : memref<3x1x256xf32, #tpu.memory_space<vmem>>, vector<1x1x256xf32>
    %4 = vector.shape_cast %3 : vector<1x1x256xf32> to vector<1x256xf32>
    %5 = vector.broadcast %4 : vector<1x256xf32> to vector<8x256xf32>
    %6 = arith.mulf %2, %5 : vector<8x256xf32>
    %c0_6 = arith.constant 0 : index
    %c0_7 = arith.constant 0 : index
    %7 = vector.load %arg8[%c0_6, %c0_7] : memref<80x256xf32, #tpu.memory_space<vmem>>, vector<8x256xf32>
    tpu.vector_store %arg8[%c0_6, %c0_7], %6 {strides = array<i32>} : memref<80x256xf32, #tpu.memory_space<vmem>>, vector<8x256xf32>,
    %8 = vector.extract_strided_slice %1 {offsets = [0, 1], sizes = [8, 256], strides = [1, 1]} : vector<8x290xf32> to vector<8x256xf32>
    %c8 = arith.constant 8 : index
    %c0_8 = arith.constant 0 : index
    %9 = vector.load %arg8[%c8, %c0_8] : memref<80x256xf32, #tpu.memory_space<vmem>>, vector<8x256xf32>
    tpu.vector_store %arg8[%c8, %c0_8], %8 {strides = array<i32>} : memref<80x256xf32, #tpu.memory_space<vmem>>, vector<8x256xf32>,
    %10 = vector.extract_strided_slice %1 {offsets = [0, 2], sizes = [8, 256], strides = [1, 1]} : vector<8x290xf32> to vector<8x256xf32>
    %c2 = arith.constant 2 : index
    %c0_9 = arith.constant 0 : index
    %c0_10 = arith.constant 0 : index
    %11 = vector.load %arg4[%c2, %c0_9, %c0_10] : memref<3x1x256xf32, #tpu.memory_space<vmem>>, vector<1x1x256xf32>
    %12 = vector.shape_cast %11 : vector<1x1x256xf32> to vector<1x256xf32>
    %13 = vector.broadcast %12 : vector<1x256xf32> to vector<8x256xf32>
    %14 = arith.mulf %10, %13 : vector<8x256xf32>
    %c16 = arith.constant 16 : index
    %c0_11 = arith.constant 0 : index
    %15 = vector.load %arg8[%c16, %c0_11] : memref<80x256xf32, #tpu.memory_space<vmem>>, vector<8x256xf32>
    tpu.vector_store %arg8[%c16, %c0_11], %14 {strides = array<i32>} : memref<80x256xf32, #tpu.memory_space<vmem>>, vector<8x256xf32>,
    %16 = vector.extract_strided_slice %1 {offsets = [0, 16], sizes = [8, 256], strides = [1, 1]} : vector<8x290xf32> to vector<8x256xf32>
    %c0_12 = arith.constant 0 : index
    %c0_13 = arith.constant 0 : index
    %c0_14 = arith.constant 0 : index
    %17 = vector.load %arg4[%c0_12, %c0_13, %c0_14] : memref<3x1x256xf32, #tpu.memory_space<vmem>>, vector<1x1x256xf32>
    %18 = vector.shape_cast %17 : vector<1x1x256xf32> to vector<1x256xf32>
    %19 = vector.broadcast %18 : vector<1x256xf32> to vector<8x256xf32>
    %20 = arith.mulf %16, %19 : vector<8x256xf32>
    %c24 = arith.constant 24 : index
    %c0_15 = arith.constant 0 : index
    %21 = vector.load %arg8[%c24, %c0_15] : memref<80x256xf32, #tpu.memory_space<vmem>>, vector<8x256xf32>
    tpu.vector_store %arg8[%c24, %c0_15], %20 {strides = array<i32>} : memref<80x256xf32, #tpu.memory_space<vmem>>, vector<8x256xf32>,
    %22 = vector.extract_strided_slice %1 {offsets = [0, 17], sizes = [8, 256], strides = [1, 1]} : vector<8x290xf32> to vector<8x256xf32>
    %c32 = arith.constant 32 : index
    %c0_16 = arith.constant 0 : index
    %23 = vector.load %arg8[%c32, %c0_16] : memref<80x256xf32, #tpu.memory_space<vmem>>, vector<8x256xf32>
    tpu.vector_store %arg8[%c32, %c0_16], %22 {strides = array<i32>} : memref<80x256xf32, #tpu.memory_space<vmem>>, vector<8x256xf32>,
    %24 = vector.extract_strided_slice %1 {offsets = [0, 18], sizes = [8, 256], strides = [1, 1]} : vector<8x290xf32> to vector<8x256xf32>
    %c2_17 = arith.constant 2 : index
    %c0_18 = arith.constant 0 : index
    %c0_19 = arith.constant 0 : index
    %25 = vector.load %arg4[%c2_17, %c0_18, %c0_19] : memref<3x1x256xf32, #tpu.memory_space<vmem>>, vector<1x1x256xf32>
    %26 = vector.shape_cast %25 : vector<1x1x256xf32> to vector<1x256xf32>
    %27 = vector.broadcast %26 : vector<1x256xf32> to vector<8x256xf32>
    %28 = arith.mulf %24, %27 : vector<8x256xf32>
    %c40 = arith.constant 40 : index
    %c0_20 = arith.constant 0 : index
    %29 = vector.load %arg8[%c40, %c0_20] : memref<80x256xf32, #tpu.memory_space<vmem>>, vector<8x256xf32>
    tpu.vector_store %arg8[%c40, %c0_20], %28 {strides = array<i32>} : memref<80x256xf32, #tpu.memory_space<vmem>>, vector<8x256xf32>,
    %30 = vector.extract_strided_slice %1 {offsets = [0, 32], sizes = [8, 256], strides = [1, 1]} : vector<8x290xf32> to vector<8x256xf32>
    %c0_21 = arith.constant 0 : index
    %c0_22 = arith.constant 0 : index
    %c0_23 = arith.constant 0 : index
    %31 = vector.load %arg4[%c0_21, %c0_22, %c0_23] : memref<3x1x256xf32, #tpu.memory_space<vmem>>, vector<1x1x256xf32>
    %32 = vector.shape_cast %31 : vector<1x1x256xf32> to vector<1x256xf32>
    %33 = vector.broadcast %32 : vector<1x256xf32> to vector<8x256xf32>
    %34 = arith.mulf %30, %33 : vector<8x256xf32>
    %c48 = arith.constant 48 : index
    %c0_24 = arith.constant 0 : index
    %35 = vector.load %arg8[%c48, %c0_24] : memref<80x256xf32, #tpu.memory_space<vmem>>, vector<8x256xf32>
    tpu.vector_store %arg8[%c48, %c0_24], %34 {strides = array<i32>} : memref<80x256xf32, #tpu.memory_space<vmem>>, vector<8x256xf32>,
    %36 = vector.extract_strided_slice %1 {offsets = [0, 33], sizes = [8, 256], strides = [1, 1]} : vector<8x290xf32> to vector<8x256xf32>
    %c56 = arith.constant 56 : index
    %c0_25 = arith.constant 0 : index
    %37 = vector.load %arg8[%c56, %c0_25] : memref<80x256xf32, #tpu.memory_space<vmem>>, vector<8x256xf32>
    tpu.vector_store %arg8[%c56, %c0_25], %36 {strides = array<i32>} : memref<80x256xf32, #tpu.memory_space<vmem>>, vector<8x256xf32>,
    %38 = vector.extract_strided_slice %1 {offsets = [0, 34], sizes = [8, 256], strides = [1, 1]} : vector<8x290xf32> to vector<8x256xf32>
    %c2_26 = arith.constant 2 : index
    %c0_27 = arith.constant 0 : index
    %c0_28 = arith.constant 0 : index
    %39 = vector.load %arg4[%c2_26, %c0_27, %c0_28] : memref<3x1x256xf32, #tpu.memory_space<vmem>>, vector<1x1x256xf32>
    %40 = vector.shape_cast %39 : vector<1x1x256xf32> to vector<1x256xf32>
    %41 = vector.broadcast %40 : vector<1x256xf32> to vector<8x256xf32>
    %42 = arith.mulf %38, %41 : vector<8x256xf32>
    %c64 = arith.constant 64 : index
    %c0_29 = arith.constant 0 : index
    %43 = vector.load %arg8[%c64, %c0_29] : memref<80x256xf32, #tpu.memory_space<vmem>>, vector<8x256xf32>
    tpu.vector_store %arg8[%c64, %c0_29], %42 {strides = array<i32>} : memref<80x256xf32, #tpu.memory_space<vmem>>, vector<8x256xf32>,
    %44 = tpu.iota {dimensions = array<i32: 0>} : vector<8x256xi32>
    %c0_i32 = arith.constant 0 : i32
    %45 = vector.broadcast %c0_i32 : i32 to vector<8x256xi32>
    %46 = arith.cmpi eq, %44, %45 : vector<8x256xi32>
    %47 = arith.extui %46 : vector<8x256xi1> to vector<8x256xi32>
    %48 = arith.sitofp %47 : vector<8x256xi32> to vector<8x256xf32>
    %c72 = arith.constant 72 : index
    %c0_30 = arith.constant 0 : index
    %49 = vector.load %arg8[%c72, %c0_30] : memref<80x256xf32, #tpu.memory_space<vmem>>, vector<8x256xf32>
    tpu.vector_store %arg8[%c72, %c0_30], %48 {strides = array<i32>} : memref<80x256xf32, #tpu.memory_space<vmem>>, vector<8x256xf32>,
    %c0_31 = arith.constant 0 : index
    %c0_32 = arith.constant 0 : index
    %50 = vector.load %arg3[%c0_31, %c0_32] : memref<64x80xf32, #tpu.memory_space<vmem>>, vector<64x80xf32>
    %c0_33 = arith.constant 0 : index
    %c0_34 = arith.constant 0 : index
    %51 = vector.load %arg8[%c0_33, %c0_34] : memref<80x256xf32, #tpu.memory_space<vmem>>, vector<80x256xf32>
    %cst = arith.constant dense<0.000000e+00> : vector<64x256xf32>
    %52 = tpu.matmul %50, %51, %cst {dimension_numbers = #tpu.dot_dimension_numbers<[1], [0], [0], [1], [0, 0, 1, 1], [], []>} : vector<64x80xf32>, vector<80x256xf32>, vector<64x256xf32> -> vector<64x256xf32>
    %c0_35 = arith.constant 0 : index
    %c0_36 = arith.constant 0 : index
    %c0_37 = arith.constant 0 : index
    %c0_38 = arith.constant 0 : index
    %53 = vector.load %arg5[%c0_35, %c0_36, %c0_37, %c0_38] : memref<1x1x1x256xi32, #tpu.memory_space<vmem>>, vector<1x1x1x256xi32>
    %54 = vector.shape_cast %53 : vector<1x1x1x256xi32> to vector<1x256xi32>
    %cst_39 = arith.constant 0.000000e+00 : f32
    %55 = vector.broadcast %cst_39 : f32 to vector<8x256xf32>
    %c0_i32_40 = arith.constant 0 : i32
    %56 = vector.broadcast %c0_i32_40 : i32 to vector<1x256xi32>
    %57 = arith.cmpi eq, %54, %56 : vector<1x256xi32>
    %58 = vector.extract_strided_slice %52 {offsets = [0, 0], sizes = [8, 256], strides = [1, 1]} : vector<64x256xf32> to vector<8x256xf32>
    %cst_41 = arith.constant 0.000000e+00 : f32
    %59 = vector.shape_cast %57 : vector<1x256xi1> to vector<1x256xi1>
    %60 = vector.broadcast %59 : vector<1x256xi1> to vector<8x256xi1>
    %61 = vector.broadcast %cst_41 : f32 to vector<8x256xf32>
    %62 = arith.select %60, %58, %61 : vector<8x256xi1>, vector<8x256xf32>
    %63 = arith.addf %55, %62 : vector<8x256xf32>
    %c1_i32 = arith.constant 1 : i32
    %64 = vector.broadcast %c1_i32 : i32 to vector<1x256xi32>
    %65 = arith.cmpi eq, %54, %64 : vector<1x256xi32>
    %66 = vector.extract_strided_slice %52 {offsets = [8, 0], sizes = [8, 256], strides = [1, 1]} : vector<64x256xf32> to vector<8x256xf32>
    %cst_42 = arith.constant 0.000000e+00 : f32
    %67 = vector.shape_cast %65 : vector<1x256xi1> to vector<1x256xi1>
    %68 = vector.broadcast %67 : vector<1x256xi1> to vector<8x256xi1>
    %69 = vector.broadcast %cst_42 : f32 to vector<8x256xf32>
    %70 = arith.select %68, %66, %69 : vector<8x256xi1>, vector<8x256xf32>
    %71 = arith.addf %63, %70 : vector<8x256xf32>
    %c2_i32 = arith.constant 2 : i32
    %72 = vector.broadcast %c2_i32 : i32 to vector<1x256xi32>
    %73 = arith.cmpi eq, %54, %72 : vector<1x256xi32>
    %74 = vector.extract_strided_slice %52 {offsets = [16, 0], sizes = [8, 256], strides = [1, 1]} : vector<64x256xf32> to vector<8x256xf32>
    %cst_43 = arith.constant 0.000000e+00 : f32
    %75 = vector.shape_cast %73 : vector<1x256xi1> to vector<1x256xi1>
    %76 = vector.broadcast %75 : vector<1x256xi1> to vector<8x256xi1>
    %77 = vector.broadcast %cst_43 : f32 to vector<8x256xf32>
    %78 = arith.select %76, %74, %77 : vector<8x256xi1>, vector<8x256xf32>
    %79 = arith.addf %71, %78 : vector<8x256xf32>
    %c3_i32 = arith.constant 3 : i32
    %80 = vector.broadcast %c3_i32 : i32 to vector<1x256xi32>
    %81 = arith.cmpi eq, %54, %80 : vector<1x256xi32>
    %82 = vector.extract_strided_slice %52 {offsets = [24, 0], sizes = [8, 256], strides = [1, 1]} : vector<64x256xf32> to vector<8x256xf32>
    %cst_44 = arith.constant 0.000000e+00 : f32
    %83 = vector.shape_cast %81 : vector<1x256xi1> to vector<1x256xi1>
    %84 = vector.broadcast %83 : vector<1x256xi1> to vector<8x256xi1>
    %85 = vector.broadcast %cst_44 : f32 to vector<8x256xf32>
    %86 = arith.select %84, %82, %85 : vector<8x256xi1>, vector<8x256xf32>
    %87 = arith.addf %79, %86 : vector<8x256xf32>
    %c4_i32 = arith.constant 4 : i32
    %88 = vector.broadcast %c4_i32 : i32 to vector<1x256xi32>
    %89 = arith.cmpi eq, %54, %88 : vector<1x256xi32>
    %90 = vector.extract_strided_slice %52 {offsets = [32, 0], sizes = [8, 256], strides = [1, 1]} : vector<64x256xf32> to vector<8x256xf32>
    %cst_45 = arith.constant 0.000000e+00 : f32
    %91 = vector.shape_cast %89 : vector<1x256xi1> to vector<1x256xi1>
    %92 = vector.broadcast %91 : vector<1x256xi1> to vector<8x256xi1>
    %93 = vector.broadcast %cst_45 : f32 to vector<8x256xf32>
    %94 = arith.select %92, %90, %93 : vector<8x256xi1>, vector<8x256xf32>
    %95 = arith.addf %87, %94 : vector<8x256xf32>
    %c5_i32 = arith.constant 5 : i32
    %96 = vector.broadcast %c5_i32 : i32 to vector<1x256xi32>
    %97 = arith.cmpi eq, %54, %96 : vector<1x256xi32>
    %98 = vector.extract_strided_slice %52 {offsets = [40, 0], sizes = [8, 256], strides = [1, 1]} : vector<64x256xf32> to vector<8x256xf32>
    %cst_46 = arith.constant 0.000000e+00 : f32
    %99 = vector.shape_cast %97 : vector<1x256xi1> to vector<1x256xi1>
    %100 = vector.broadcast %99 : vector<1x256xi1> to vector<8x256xi1>
    %101 = vector.broadcast %cst_46 : f32 to vector<8x256xf32>
    %102 = arith.select %100, %98, %101 : vector<8x256xi1>, vector<8x256xf32>
    %103 = arith.addf %95, %102 : vector<8x256xf32>
    %c6_i32 = arith.constant 6 : i32
    %104 = vector.broadcast %c6_i32 : i32 to vector<1x256xi32>
    %105 = arith.cmpi eq, %54, %104 : vector<1x256xi32>
    %106 = vector.extract_strided_slice %52 {offsets = [48, 0], sizes = [8, 256], strides = [1, 1]} : vector<64x256xf32> to vector<8x256xf32>
    %cst_47 = arith.constant 0.000000e+00 : f32
    %107 = vector.shape_cast %105 : vector<1x256xi1> to vector<1x256xi1>
    %108 = vector.broadcast %107 : vector<1x256xi1> to vector<8x256xi1>
    %109 = vector.broadcast %cst_47 : f32 to vector<8x256xf32>
    %110 = arith.select %108, %106, %109 : vector<8x256xi1>, vector<8x256xf32>
    %111 = arith.addf %103, %110 : vector<8x256xf32>
    %c7_i32 = arith.constant 7 : i32
    %112 = vector.broadcast %c7_i32 : i32 to vector<1x256xi32>
    %113 = arith.cmpi eq, %54, %112 : vector<1x256xi32>
    %114 = vector.extract_strided_slice %52 {offsets = [56, 0], sizes = [8, 256], strides = [1, 1]} : vector<64x256xf32> to vector<8x256xf32>
    %cst_48 = arith.constant 0.000000e+00 : f32
    %115 = vector.shape_cast %113 : vector<1x256xi1> to vector<1x256xi1>
    %116 = vector.broadcast %115 : vector<1x256xi1> to vector<8x256xi1>
    %117 = vector.broadcast %cst_48 : f32 to vector<8x256xf32>
    %118 = arith.select %116, %114, %117 : vector<8x256xi1>, vector<8x256xf32>
    %119 = arith.addf %111, %118 : vector<8x256xf32>
    %cst_49 = arith.constant 1.000000e-01 : f32
    %120 = vector.broadcast %cst_49 : f32 to vector<8x256xf32>
    %121 = arith.mulf %119, %120 : vector<8x256xf32>
    %c0_50 = arith.constant 0 : index
    %c0_51 = arith.constant 0 : index
    %c0_52 = arith.constant 0 : index
    %122 = vector.load %arg6[%c0_50, %c0_51, %c0_52] : memref<1x8x256xf32, #tpu.memory_space<vmem>>, vector<1x8x256xf32>
    %123 = vector.shape_cast %122 : vector<1x8x256xf32> to vector<8x256xf32>
    %124 = arith.addf %121, %123 : vector<8x256xf32>
    %c0_53 = arith.constant 0 : index
    %c0_54 = arith.constant 0 : index
    %c0_55 = arith.constant 0 : index
    %125 = vector.load %arg7[%c0_53, %c0_54, %c0_55] : memref<1x8x256xf32, #tpu.memory_space<vmem>>, vector<1x8x256xf32>
    %126 = vector.shape_cast %125 : vector<1x8x256xf32> to vector<8x256xf32>
    %127 = vector.shape_cast %124 : vector<8x256xf32> to vector<1x8x256xf32>
    tpu.vector_store %arg7[%c0_53, %c0_54, %c0_55], %127 {strides = array<i32>} : memref<1x8x256xf32, #tpu.memory_space<vmem>>, vector<1x8x256xf32>,
    return
  }
  func.func @transform_0(%arg0: i32, %arg1: i32) -> (i32, i32, i32, i32) {
    %c0_i32 = arith.constant 0 : i32
    %c0_i32_0 = arith.constant 0 : i32
    %c0_i32_1 = arith.constant 0 : i32
    return %arg0, %arg1, %c0_i32, %c0_i32_0 : i32, i32, i32, i32
  }
  func.func @transform_1(%arg0: i32, %arg1: i32) -> (i32, i32) {
    %c0_i32 = arith.constant 0 : i32
    %c0_i32_0 = arith.constant 0 : i32
    %c0_i32_1 = arith.constant 0 : i32
    return %c0_i32, %c0_i32_0 : i32, i32
  }
  func.func @transform_2(%arg0: i32, %arg1: i32) -> (i32, i32, i32) {
    %c0_i32 = arith.constant 0 : i32
    %c0_i32_0 = arith.constant 0 : i32
    %c0_i32_1 = arith.constant 0 : i32
    %c0_i32_2 = arith.constant 0 : i32
    return %c0_i32, %c0_i32_0, %c0_i32_1 : i32, i32, i32
  }
  func.func @transform_3(%arg0: i32, %arg1: i32) -> (i32, i32, i32, i32) {
    %c0_i32 = arith.constant 0 : i32
    %c0_i32_0 = arith.constant 0 : i32
    %c0_i32_1 = arith.constant 0 : i32
    return %arg0, %arg1, %c0_i32, %c0_i32_0 : i32, i32, i32, i32
  }
  func.func @transform_4(%arg0: i32, %arg1: i32) -> (i32, i32, i32) {
    %c0_i32 = arith.constant 0 : i32
    %c0_i32_0 = arith.constant 0 : i32
    return %arg0, %c0_i32, %arg1 : i32, i32, i32
  }
  func.func @transform_5(%arg0: i32, %arg1: i32) -> (i32, i32, i32) {
    %c0_i32 = arith.constant 0 : i32
    %c0_i32_0 = arith.constant 0 : i32
    return %arg0, %c0_i32, %arg1 : i32, i32, i32
  }
}

</mosaic_0001>

<bundles_post_ra>
// kernel: tpu_custom_call.1
= control target key start
LH: loop header
LB: loop body
LE: loop exit
PB: predicated region body
PF: predicated region fallthrough
CT: control target
= control target key end

     0   :  { %s1950_s0 = inlined_call_operand.hbm [shape: f32[2,1,8,290], index: 0, kind: input, shape index: {}]   ;;  %s1951_s1 = inlined_call_operand.hbm [shape: f32[64,80], index: 1, kind: input, shape index: {}]   ;;  %s1952_s2 = inlined_call_operand.vmem [shape: f32[3,1,256], index: 2, kind: input, shape index: {}]   ;;  %s1953_s3 = inlined_call_operand.vmem [shape: s32[2,1,1,256], index: 3, kind: input, shape index: {}]   ;;  %s1954_s4 = inlined_call_operand.hbm [shape: f32[2,8,256], index: 4, kind: input, shape index: {}]   ;;  %s1955_s5 = inlined_call_operand.hbm [shape: f32[2,8,256], index: 5, kind: output, shape index: {}]  }
   0x1   :  { %1965 = sst [smem:[#allocation17_spill]] %s1950_s0 }
   0x2   :  { %10 = vsyncpa [#allocation4], 0 }
   0x3   :  { %12 = vsyncpa [#allocation4 + $0x1], 0 }
   0x4   :  { %13 = vsyncpa [#allocation7], 0 }
   0x5   :  { %14 = vsyncpa [#allocation5], 0 }
   0x6   :  { %16 = vsyncpa [#allocation5 + $0x1], 0  ;;  %s1500_s18 = smov 0   ;;  %s1502_s19 = smov 0  }
   0x7   :  { %s1504_s20 = smov 0   ;;  %s1506_s21 = smov 0  }
   0x8   :  { %s1508_s22 = smov 0   ;;  %s1510_s23 = smov 0  }
   0x9 LB: > { %1966 = sst [smem:[#allocation14_spill]] %s1441_s22  ;;  %s34_s24 = sadd.s32 1, %s1441_s22  ;;  %s1445_s23 = sphi %s1510_s23, %s22_s23   ;;  %s1441_s22 = sphi %s1508_s22, %s2008_s22   ;;  %s1437_s21 = sphi %s1506_s21, %s2007_s21   ;;  %s1433_s20 = sphi %s1504_s20, %s2011_s20   ;;  %s1429_s19 = sphi %s1502_s19, %s2010_s19   ;;  %s1425_s18 = sphi %s1500_s18, %s2009_s18  }
   0xa   : > { %s43_s25 = sadd.s32 1, %s1433_s20  ;;  %p36_p0 = scmp.ge.s32.totalorder %s34_s24, 2 }
   0xb   : > { %p50_p1 = scmp.ne.s32.totalorder %s1433_s20, %s1429_s19  ;;  %p51_p2 = scmp.eq.s32.totalorder %s1445_s23, 0 }
   0xc   : > { %s2013_s24 = smov (%p36_p0, %s34_s24), 0  ;;  %p1156_p5 = scmp.lt.s32.totalorder %s1445_s23, 2 }
   0xd   : > { %1967 = sst [smem:[#allocation15_spill]] %s2013_s24  ;;  %p52_p4 = por %p51_p2, %p50_p1 }
   0xe   : > { %s38_s26 = ssub.s32 %s1441_s22, %s2013_s24  ;;  %s222_s27 = sand.u32 1, %s1445_s23  }
   0xf   : > { %p41_p6 = scmp.eq.s32.totalorder %s38_s26, 0  ;;  %s224_s28 = sand.u32 1, %s1433_s20  }
  0x10   : > { %s1128_s29 = smul.u32 384, %s1441_s22  ;;  %s1969_s0 = sld [smem:[#allocation17_spill]] }
  0x11   : > { %s1548_s30 = scalar_select %p41_p6, %s1433_s20, %s43_s25  }
  0x12   : > { %s1127_s6 = smul.u32 24, %s224_s28  ;;  %p1557_p7 = pnand %p1156_p5, %p52_p4 }
  0x13   : > { %1968 = sst [smem:[#allocation16_spill]] %s1548_s30  ;;  %s1563_s13 = scalar_lea.sflag [#allocation4], %s222_s27 }
  0x14   : > { %s1970_s10 = scalar_select %p1557_p7, 1, 0 }
  0x15   : > { %s226_s11 = scalar_lea.vmem [#allocation3], %s1127_s6  ;;  %p1959_p9 = pneg %p1557_p7 }
  0x16   : > { %s1555_s9 = scalar_lea.hbm %s1969_s0, %s1128_s29  ;;  %s236_s12 = sshll.u32 %s226_s11, 4  ;;  %s1561_s12 = int_to_ptr.vmem [resolvable:$true] %s236_s12 }
  0x17   : > { %s1267_s14 = scalar_lea.hbm %s1555_s9, 384  ;;  %s1272_s17 = scalar_lea.hbm %s1969_s0, 768 }
  0x18   : > { %p1268_p8 = scmp.ne.s32.totalorder %s1555_s9, %s1267_s14  ;;  %p1273_p12 = scmp.lt.u32.totalorder %s1555_s9, %s1969_s0 }
  0x19   : > { %p1274_p13 = scmp.lt.u32.totalorder %s1272_s17, %s1267_s14  ;;  %p1276_p2 = scmp.lt.u32.totalorder %s1267_s14, %s1555_s9 }
  0x1a   : > { %p1270_p10 = pnand %p1959_p9, %p1268_p8 }
  0x1b   : > { %p1275_p0 = por %p1274_p13, %p1273_p12 }
  0x1c   : > { %p1271_p11 = pneg %p1270_p10 }
  0x1d   : > { %p1277_p4 = por %p1276_p2, %p1275_p0 }
  0x1f   : > { %p1278_p5 = pnand %p1277_p4, %p1271_p11 }
  0x21   : > { %1281 = shalt.err (!%p1278_p5)
}
  0x22   : > { %s1282_s27 = scalar_lea.vmem %s1561_s12, 384  ;;  %s1447_s29 = smov [#allocation3]  }
  0x23   : > { %p1283_p6 = scmp.ne.s32.totalorder %s1561_s12, %s1282_s27  ;;  %s1287_s6 = sshll.u32 %s1447_s29, 4  ;;  %s1288_s6 = int_to_ptr.vmem [resolvable:$false] %s1287_s6 }
  0x24   : > { %s1289_s7 = scalar_lea.vmem %s1288_s6, 768  ;;  %p1290_p3 = scmp.lt.s32.totalorder %s1561_s12, %s1288_s6 }
  0x25   : > { %p1285_p8 = pnand %p1283_p6, %p1959_p9  ;;  %p1291_p12 = scmp.lt.s32.totalorder %s1289_s7, %s1282_s27 }
  0x27   : > { %p1286_p10 = pneg %p1285_p8  ;;  %p1292_p13 = por %p1291_p12, %p1290_p3 }
  0x29   : > { %p1293_p0 = pnand %p1292_p13, %p1286_p10 }
  0x2b   : > { %1296 = shalt.err (!%p1293_p0)
}
  0x2c   : > { %1147 = dma.hbm_to_vmem [thread:$0]  (!%p1557_p7), %s1555_s9, 384, %s1561_s12, %s1563_s13  }
  0x2d   : > { %s1592_s8 = sadd.s32 4294967295, %s1445_s23   ;;  %s1061_s11 = sadd.s32 4294967294, %s1445_s23  }
  0x2e   : > { %p56_p3 = scmp.ne.s32.totalorder %s1429_s19, %s1425_s18  ;;  %p1958_p11 = scmp.eq.s32.totalorder %s1592_s8, 0 }
  0x2f   : > { %p180_p2 = scmp.eq.s32.totalorder %s1592_s8, 1  ;;  %p186_p4 = scmp.eq.s32.totalorder %s1061_s11, 1 }
  0x30   : > { %p1062_p5 = scmp.ge.s32.totalorder %s1445_s23, 1  ;;  %p1602_p6 = por %p1958_p11, %p56_p3 }
  0x31   : > { %p1609_p8 = por %p180_p2, %p50_p1  ;;  %p1613_p10 = por %p186_p4, %p56_p3 }
  0x32   : > { %s1971_s14 = scalar_select %p1602_p6, 1, 0 }
  0x33   : > { %s1972_s9 = scalar_select %p1609_p8, 1, 0 }
  0x34   : > { %s1973_s12 = scalar_select %p1613_p10, 1, 0 }
  0x35   : > { %p193_p12 = scmp.lt.s32.totalorder %s1445_s23, 3  ;;  %s1448_s16 = smov [#allocation6]  }
  0x36   : > { %s205_s17 = sshll.u32 %s1448_s16, 4  ;;  %s1066_s25 = sshll.u32 %s224_s28, 4  ;;  %s1622_s17 = int_to_ptr.vmem [resolvable:$true] %s205_s17 }
  0x37   : > { %p1618_p13 = pnand %p1062_p5, %p193_p12  ;;  %s1091_s26 = sshll.u32 %s1441_s22, 8 }
  0x38   : > { %s1638_s7 = scalar_lea.hbm %s1954_s4, %s1091_s26  ;;  %s258_s11 = scalar_lea.vmem [#allocation8], %s1066_s25 }
  0x39   : > { %s1974_s15 = scalar_select %p1618_p13, 1, 0 }
  0x3a   : > { %p1140_p0 = pneg %p1618_p13  ;;  %s268_s16 = sshll.u32 %s258_s11, 4  ;;  %s1640_s16 = int_to_ptr.vmem [resolvable:$true] %s268_s16 }
  0x3b   : > { %s1297_s28 = scalar_lea.hbm %s1951_s1, 1024 }
  0x3c   : > { %p1631_p1 = pnand %p1140_p0, %p1958_p11  ;;  %p1298_p3 = scmp.ne.s32.totalorder %s1951_s1, %s1297_s28 }
  0x3d   : > { %p1304_p12 = scmp.lt.u32.totalorder %s1297_s28, %s1951_s1 }
  0x3e   : > { %p1299_p2 = pneg %p1631_p1 }
  0x40   : > { %p1300_p4 = pnand %p1299_p2, %p1298_p3 }
  0x42   : > { %p1301_p5 = pneg %p1300_p4 }
  0x44   : > { %p1306_p0 = pnand %p1304_p12, %p1301_p5 }
  0x46   : > { %1309 = shalt.err (!%p1306_p0)
}
  0x47   : > { %s1310_s25 = scalar_lea.vmem %s1622_s17, 1024  ;;  %p1318_p8 = scmp.lt.s32.totalorder %s1622_s17, %s1622_s17 }
  0x48   : > { %p1311_p11 = scmp.ne.s32.totalorder %s1622_s17, %s1310_s25  ;;  %p1319_p6 = scmp.lt.s32.totalorder %s1310_s25, %s1310_s25 }
  0x4a   : > { %p1313_p9 = pnand %p1311_p11, %p1299_p2  ;;  %p1320_p13 = por %p1319_p6, %p1318_p8 }
  0x4c   : > { %p1314_p10 = pneg %p1313_p9 }
  0x4e   : > { %p1321_p7 = pnand %p1320_p13, %p1314_p10 }
  0x50   : > { %1324 = shalt.err (!%p1321_p7)
}
  0x51   : > { %s1449_s0 = smov 128   ;;  %s1450_s22 = smov 8  }
  0x52   : > { %1143 = dma.hbm_to_vmem [thread:$0]  (!%p1631_p1), %s1951_s1, 1024, %s1622_s17, [#allocation7], %s1449_s0, %s1449_s0, %s1450_s22  }
  0x53   : > { %s1325_s26 = scalar_lea.hbm %s1638_s7, 256  ;;  %p1976_p11 = scmp.ne.s32.totalorder %s1970_s10, 0 }
  0x54   : > { %p1326_p9 = scmp.ne.s32.totalorder %s1638_s7, %s1325_s26  ;;  %s1330_s29 = scalar_lea.hbm %s1954_s4, 512 }
  0x55   : > { %p1977_p6 = pneg %p1976_p11  ;;  %p1331_p10 = scmp.lt.u32.totalorder %s1638_s7, %s1954_s4 }
  0x56   : > { %p1332_p13 = scmp.lt.u32.totalorder %s1330_s29, %s1325_s26  ;;  %p1334_p2 = scmp.lt.u32.totalorder %s1325_s26, %s1638_s7 }
  0x57   : > { %p1328_p8 = pnand %p1326_p9, %p1977_p6 }
  0x58   : > { %p1333_p3 = por %p1332_p13, %p1331_p10 }
  0x59   : > { %p1329_p7 = pneg %p1328_p8 }
  0x5a   : > { %p1335_p4 = por %p1334_p2, %p1333_p3 }
  0x5c   : > { %p1336_p5 = pnand %p1335_p4, %p1329_p7 }
  0x5e   : > { %1339 = shalt.err (!%p1336_p5)
}
  0x5f   : > { %s1340_s17 = scalar_lea.vmem %s1640_s16, 256  ;;  %p1978_p12 = pmov %p1977_p6 }
  0x60   : > { %p1341_p1 = scmp.ne.s32.totalorder %s1640_s16, %s1340_s17  ;;  %s1451_s27 = smov [#allocation8]  }
  0x61   : > { %s1345_s0 = sshll.u32 %s1451_s27, 4  ;;  %s1346_s0 = int_to_ptr.vmem [resolvable:$false] %s1345_s0 }
  0x62   : > { %p1343_p0 = pnand %p1341_p1, %p1978_p12  ;;  %s1347_s22 = scalar_lea.vmem %s1346_s0, 512 }
  0x63   : > { %p1348_p6 = scmp.lt.s32.totalorder %s1640_s16, %s1346_s0  ;;  %p1349_p8 = scmp.lt.s32.totalorder %s1347_s22, %s1340_s17 }
  0x64   : > { %p1344_p9 = pneg %p1343_p0 }
  0x65   : > { %p1350_p10 = por %p1349_p8, %p1348_p6 }
  0x67   : > { %p1351_p13 = pnand %p1350_p10, %p1344_p9 }
  0x69   : > { %1354 = shalt.err (!%p1351_p13)
}
  0x6a   : > { %1150 = dma.hbm_to_vmem [thread:$0]  (!%p1976_p11), %s1638_s7, 256, %s1640_s16, %s1563_s13  }
  0x6b   : > { %p1979_p7 = scmp.ne.s32.totalorder %s1974_s15, 0 }
  0x6c   : > { %s279_s24 = sand.u32 (!%p1979_p7), 1, %s1592_s8   ;;  %s1691_s30 = sand.u32 (!%p1979_p7), 1, %s1429_s19  }
  0x6d   : > { %277 = sbr.rel (%p1979_p7) target bundleno = 651 (0x28b), region = 40  ;;  %s280_s11 = scalar_lea.sflag (!%p1979_p7), [#allocation4], %s279_s24 }
  0x6e   : > { %s1129_s26 = smul.u32 (!%p1979_p7), 24, %s1691_s30  ;;  %p1980_p3 = scmp.ne.s32.totalorder (!%p1979_p7), %s1971_s14, 0 }
  0x70   : > { %s1694_s28 = scalar_lea.vmem (!%p1979_p7), [#allocation3], %s1129_s26 }
  0x74   : > { %1408 = dma.done.wait (%p1980_p3), %s280_s11, 384  }
  0x75   : > { %1410 = vsyncadd (%p1980_p3), %s280_s11, 4294966912  ;;  %p1981_p11 = scmp.eq.s32.totalorder %s1592_s8, 0 }
  0x77   : > { %1412 = dma.done.wait (%p1981_p11), [#allocation7], 1024   ;;  %p1982_p2 = pmov %p1981_p11 }
  0x78   : > { %s1071_s10 = sshll.u32 %s1691_s30, 4 }
  0x79   : > { %1414 = vsyncadd (%p1982_p2), [#allocation7], 4294966272  ;;  %s1707_s13 = scalar_lea.vmem [#allocation8], %s1071_s10 }
  0x7a   : > { %1416 = dma.done.wait (%p1980_p3), %s280_s11, 256  }
  0x7b   : > { %1418 = vsyncadd (%p1980_p3), %s280_s11, 4294967040  ;;  %v351_v0 = vlaneseq  ;;  %v420_v4 = vld [vmem:[%s1952_s2] sm:$0x3]  ;;  %v1074_v5 = vld [vmem:[%s1952_s2 + $0x4] sm:$0x3]  ;;  %s1452_s14 = smov 16  }
  0x7c   : > { %s1453_s29 = smov 2   ;;  %v1075_v10 = vld [vmem:[%s1952_s2 + $0x4] sm:$0x3]  ;;  %v509_v13 = vld [vmem:[%s1952_s2] sm:$0x3]  ;;  %s1454_s0 = smov 18  }
  0x7d   : > { %v1713_v1 = vshrl.u32 %v351_v0, 7  ;;  %v1076_v16 = vld [vmem:[%s1952_s2 + $0x4] sm:$0x3]  ;;  %s1455_s26 = smov 32   ;;  %v348_v20 = vld [vmem:[%s1694_s28 + $0x10] sm:$0xff]  ;;  %s1456_s11 = smov 34  }
  0x7e   : > { %v1747_v19 = vld [vmem:[%s1694_s28 + $0x8] sm:$0xff]  ;;  %v1754_v22 = vld [vmem:[%s1694_s28] sm:$0xff]  ;;  %s1457_s8 = smov 127   ;;  %s1458_s15 = smov 111   ;;  %vm434_vm0 = vcmask 130048   ;;  %vm396_vm1 = vcmask 15360  }
  0x7f   : > { %v1716_v2 = vsub.s32 0, %v1713_v1  ;;  %v1719_v3 = vsub.s32 1, %v1713_v1  ;;  %v1751_v21 = vpack.i.bf16 %v348_v20, %v1747_v19  ;;  %s1459_s28 = smov 126   ;;  %s1460_s7 = smov 112   ;;  %vm485_vm2 = vcmask 146432  }
  0x80   : > { %vm523_vm3 = vcmask 261120   ;;  %s1461_s16 = smov 110   ;;  %v349_v48 = vld [vmem:[%s1952_s2] sm:$0x3]  ;;  %vm574_vm4 = vcmask 277504   ;;  %s1462_s6 = smov 96  }
  0x81   : > { %v425_v6 = vrot.slane %v420_v4, %v1716_v2  ;;  %v387_v7 = vrot.slane %v1074_v5, %v1716_v2  ;;  %v429_v8 = vrot.slane %v420_v4, %v1719_v3  ;;  %v391_v9 = vrot.slane %v1074_v5, %v1719_v3  ;;  %s1464_s25 = smov 95   ;;  %s1465_s17 = smov 94  }
  0x82   : > { %v480_v11 = vrot.slane %v1075_v10, %v1719_v3  ;;  %v476_v12 = vrot.slane %v1075_v10, %v1716_v2  ;;  %v514_v14 = vrot.slane %v509_v13, %v1716_v2  ;;  %v518_v15 = vrot.slane %v509_v13, %v1719_v3  ;;  %p336_p4 = scmp.lt.s32.totalorder %s1437_s21, 1  ;;  %p2003_p1 = scmp.ne.s32.totalorder %s1972_s9, 0 }
  0x83   : > { %430 = vrot.lane.b32.xlu1 %v425_v6, %s1452_s14  ;;  %392 = vrot.lane.b32.xlu0 %v387_v7, %s1453_s29  ;;  %v569_v17 = vrot.slane %v1076_v16, %v1719_v3  ;;  %v565_v18 = vrot.slane %v1076_v16, %v1716_v2  ;;  %v358_v53 = vrot.slane %v349_v48, %v1719_v3  ;;  %vm374_vm5 = vcmask 1039360  }
  0x84   : > { %v354_v54 = vrot.slane %v349_v48, %v1716_v2  ;;  %v1463_v5 = vmov 0.0   ;;  %vm413_vm6 = vcmask 1031168   ;;  %vm451_vm7 = vcmask 916480   ;;  %s337_s27 = scalar_select %p336_p4, %s1437_s21, 1 }
  0x85   : > { %v362_v62 = vmul.f32 %v358_v53, %v1747_v19  ;;  %722 = vmatprep.mubr.f32.mxu0 %v1463_v5  ;;  %746 = vmatprep.mubr.f32.mxu1 %v1463_v5  ;;  %vm464_vm8 = vcmask 908288   ;;  %vm502_vm9 = vcmask 900096   ;;  %vm540_vm10 = vcmask 785408  }
  0x86   : > { %v361_v63 = vmul.f32 %v354_v54, %v1754_v22  ;;  %vm553_vm11 = vcmask 777216   ;;  %vm591_vm12 = vcmask 769024   ;;  %vm600_vm13 = vcmp.eq.s32.totalorder %v1713_v1, 0 }
  0x87   : > { %432 = vrot.lane.b32.xlu1 %v429_v8, %s1452_s14  ;;  %394 = vrot.lane.b32.xlu0 %v391_v9, %s1453_s29  ;;  %vm1467_vm14 = vmmov 1  }
  0x88   : > { %vm1112_vm15 = vmpackc.low %vm600_vm13, %vm1467_vm14 }
  0x8b   : > { %483 = vrot.lane.b32.xlu1 %v480_v11, %s1454_s0  ;;  %481 = vrot.lane.b32.xlu0 %v476_v12, %s1454_s0  ;;  %s1073_s0 = sshll.u32 %s337_s27, 1 }
  0x8f   : > { %519 = vrot.lane.b32.xlu0 %v514_v14, %s1455_s26  ;;  %521 = vrot.lane.b32.xlu1 %v518_v15, %s1455_s26  ;;  %s343_s26 = scalar_lea.vmem %s1953_s3, %s1073_s0 }
  0x93   : > { %572 = vrot.lane.b32.xlu1 %v569_v17, %s1456_s11  ;;  %570 = vrot.lane.b32.xlu0 %v565_v18, %s1456_s11  ;;  %s1092_s11 = sshll.u32 %s1437_s21, 8 }
  0x97   : > { %1228 = vrot.lane.b32.xlu0 %v1751_v21, %s1457_s8  ;;  %368 = vrot.lane.b32.xlu1 %v1754_v22, %s1457_s8  ;;  %s335_s8 = scalar_lea.vmem [#allocation9], %s1071_s10  ;;  %s1469_s10 = smov [#allocation9]  }
  0x98   : > { %s1359_s14 = sshll.u32 %s1469_s10, 4  ;;  %s1360_s14 = int_to_ptr.vmem [resolvable:$false] %s1359_s14 }
  0x99   : > { %s1361_s29 = scalar_lea.vmem %s1360_s14, 512 }
  0x9b   : > { %1233 = vrot.lane.b32.xlu0 %v1751_v21, %s1458_s15 }
  0x9f   : > { %458 = vrot.lane.b32.xlu0 %v1754_v22, %s1458_s15  ;;  %s925_s15 = sshll.u32 %s335_s8, 4  ;;  %s1903_s15 = int_to_ptr.vmem [resolvable:$true] %s925_s15 }
  0xa0   : > { %s1355_s21 = scalar_lea.vmem %s1903_s15, 256  ;;  %p1362_p9 = scmp.lt.s32.totalorder %s1903_s15, %s1360_s14 }
  0xa1   : > { %p1356_p5 = scmp.ne.s32.totalorder %s1903_s15, %s1355_s21  ;;  %p1363_p6 = scmp.lt.s32.totalorder %s1361_s29, %s1355_s21 }
  0xa3   : > { %p1357_p12 = pnand %p1356_p5, %p2003_p1  ;;  %p1364_p8 = por %p1363_p6, %p1362_p9 }
  0xa5   : > { %p1358_p0 = pneg %p1357_p12 }
  0xa7   : > { %p1365_p10 = pnand %p1364_p8, %p1358_p0 }
  0xf5   : > { %v431_v23 = vpop.permute.xlu1 %430  ;;  %v393_v24 = vpop.permute.xlu0 %392 }
  0xf6   : > { %v439_v25 = vmul.f32 %v431_v23, %v1754_v22  ;;  %v401_v26 = vmul.f32 %v393_v24, %v1754_v22 }
  0xf8   : > { %407 = vrot.lane.b32.xlu0 %v401_v26, %s1459_s28  ;;  %445 = vrot.lane.b32.xlu1 %v439_v25, %s1460_s7 }
  0xf9   : > { %v433_v27 = vpop.permute.xlu1 %432  ;;  %v395_v28 = vpop.permute.xlu0 %394 }
  0xfa   : > { %v435_v29 = vsel %vm434_vm0, %v431_v23, %v433_v27  ;;  %v397_v30 = vsel %vm396_vm1, %v393_v24, %v395_v28  ;;  %v403_v31 = vmul.f32 %v395_v28, %v348_v20  ;;  %v441_v34 = vmul.f32 %v433_v27, %v348_v20 }
  0xfb   : > { %v402_v32 = vmul.f32 %v397_v30, %v1747_v19  ;;  %v440_v33 = vmul.f32 %v435_v29, %v1747_v19  ;;  %vm633_vm0 = vcmask 654336  }
  0xfd   : > { %v1237_v35 = vpack.i.bf16 %v403_v31, %v402_v32  ;;  %v484_v36 = vpop.permute.xlu1 %483  ;;  %v482_v37 = vpop.permute.xlu0 %481  ;;  %v1242_v40 = vpack.i.bf16 %v441_v34, %v440_v33 }
  0xfe   : > { %v490_v38 = vmul.f32 %v482_v37, %v1754_v22  ;;  %v486_v39 = vsel %vm485_vm2, %v482_v37, %v484_v36  ;;  %v492_v41 = vmul.f32 %v484_v36, %v348_v20 }
  0xff   : > { %1238 = vrot.lane.b32.xlu0 %v1237_v35, %s1459_s28  ;;  %v491_v44 = vmul.f32 %v486_v39, %v1747_v19 }
 0x100   : > { %496 = vrot.lane.b32.xlu1 %v490_v38, %s1461_s16 }
 0x101   : > { %v520_v42 = vpop.permute.xlu0 %519  ;;  %v522_v43 = vpop.permute.xlu1 %521  ;;  %v1247_v55 = vpack.i.bf16 %v492_v41, %v491_v44 }
 0x102   : > { %v528_v45 = vmul.f32 %v520_v42, %v1754_v22  ;;  %v524_v46 = vsel %vm523_vm3, %v520_v42, %v522_v43  ;;  %v530_v47 = vmul.f32 %v522_v43, %v348_v20 }
 0x103   : > { %v529_v49 = vmul.f32 %v524_v46, %v1747_v19 }
 0x104   : > { %1243 = vrot.lane.b32.xlu1 %v1242_v40, %s1460_s7  ;;  %534 = vrot.lane.b32.xlu0 %v528_v45, %s1462_s6 }
 0x105   : > { %v1257_v50 = vpack.i.bf16 %v530_v47, %v529_v49  ;;  %v573_v51 = vpop.permute.xlu1 %572  ;;  %v571_v52 = vpop.permute.xlu0 %570 }
 0x106   : > { %v581_v56 = vmul.f32 %v573_v51, %v348_v20  ;;  %v575_v57 = vsel %vm574_vm4, %v571_v52, %v573_v51  ;;  %v579_v10 = vmul.f32 %v571_v52, %v1754_v22 }
 0x107   : > { %v580_v58 = vmul.f32 %v575_v57, %v1747_v19 }
 0x108   : > { %1248 = vrot.lane.b32.xlu1 %v1247_v55, %s1461_s16  ;;  %1258 = vrot.lane.b32.xlu0 %v1257_v50, %s1462_s6  ;;  %s1901_s16 = scalar_lea.hbm %s1955_s5, %s1092_s11 }
 0x109   : > { %v1262_v59 = vpack.i.bf16 %v581_v56, %v580_v58  ;;  %v1229_v60 = vpop.permute.xlu0 %1228  ;;  %v369_v61 = vpop.permute.xlu1 %368  ;;  %v1466_v56 = vmov 1.0  }
 0x10a   : > { %v1231_v0 = vunpack.i.h.bf16 %v1229_v60  ;;  %v1230_v4 = vunpack.i.l.bf16 %v1229_v60 }
 0x10c   : > { %1253 = vrot.lane.b32.xlu1 %v1751_v21, %s1464_s25  ;;  %1263 = vrot.lane.b32.xlu0 %v1262_v59, %s1465_s17  ;;  %v375_v6 = vsel %vm374_vm5, %v369_v61, %v1230_v4  ;;  %v376_v7 = vsel %vm374_vm5, %v1230_v4, %v1231_v0  ;;  %v605_v61 = vld [vmem:[#allocation6] sm:$0xff]  ;;  %v610_v0 = vld [vmem:[#allocation6 + $0x28] sm:$0xff]  ;;  %v607_v4 = vld [vmem:[#allocation6 + $0x10] sm:$0xff] }
 0x10d   : > { %v1095_v8 = vpack.c.bf16 %v376_v7, %v362_v62  ;;  %v1097_v9 = vpack.c.bf16 %v375_v6, %v361_v63  ;;  %v1234_v11 = vpop.permute.xlu0 %1233  ;;  %v609_v62 = vld [vmem:[#allocation6 + $0x20] sm:$0xff]  ;;  %v606_v63 = vld [vmem:[#allocation6 + $0x8] sm:$0xff]  ;;  %v611_v6 = vld [vmem:[#allocation6 + $0x30] sm:$0xff] }
 0x10e   : > { %v1236_v24 = vunpack.i.h.bf16 %v1234_v11  ;;  %v1235_v25 = vunpack.i.l.bf16 %v1234_v11  ;;  %v608_v7 = vld [vmem:[#allocation6 + $0x18] sm:$0xff] }
 0x10f   : > { %1096 = vmatprep.subr.bf16.mxu0 %v1095_v8  ;;  %1117 = vmatprep.subr.bf16.mxu1 %v1095_v8  ;;  %v612_v8 = vld [vmem:[#allocation6 + $0x38] sm:$0xff] }
 0x110   : > { %547 = vrot.lane.b32.xlu1 %v1754_v22, %s1464_s25  ;;  %1098 = vmatpush1.bf16.msra.mxu0 %v1097_v9  ;;  %v466_v37 = vsel %vm464_vm8, %v1235_v25, %v1236_v24 }
 0x111   : > { %1122 = vmatpush1.bf16.msra.mxu1 %v1097_v9  ;;  %v459_v12 = vpop.permute.xlu0 %458  ;;  %v771_v9 = vld [vmem:[%s343_s26] sm:$0x3] }
 0x112   : > { %v465_v38 = vsel %vm464_vm8, %v459_v12, %v1235_v25  ;;  %vm772_vm1 = vcmp.eq.s32.totalorder %v771_v9, 0  ;;  %vm788_vm2 = vcmp.eq.s32.totalorder %v771_v9, 1  ;;  %vm804_vm3 = vcmp.eq.s32.totalorder %v771_v9, 2 }
 0x113   : > { %vm820_vm4 = vcmp.eq.s32.totalorder %v771_v9, 3  ;;  %vm836_vm5 = vcmp.eq.s32.totalorder %v771_v9, 4  ;;  %vm884_vm13 = vcmp.eq.s32.totalorder %v771_v9, 7 }
 0x114   : > { %585 = vrot.lane.b32.xlu1 %v579_v10, %s1465_s17  ;;  %v1468_v10 = vmov 0  }
 0x115   : > { %v773_v11 = vsel %vm772_vm1, 1, %v1468_v10  ;;  %v789_v12 = vsel %vm788_vm2, 1, %v1468_v10  ;;  %v821_v25 = vsel %vm820_vm4, 1, %v1468_v10 }
 0x16a   : > { %v446_v13 = vpop.permute.xlu1 %445  ;;  %v408_v14 = vpop.permute.xlu0 %407 }
 0x171   : > { %v1239_v15 = vpop.permute.xlu0 %1238 }
 0x172   : > { %v497_v16 = vpop.permute.xlu1 %496  ;;  %v1241_v17 = vunpack.i.h.bf16 %v1239_v15  ;;  %v1240_v18 = vunpack.i.l.bf16 %v1239_v15  ;;  %v781_v15 = vrot.slane %v773_v11, %v1719_v3 }
 0x174   : > { %v415_v26 = vsel %vm413_vm6, %v1240_v18, %v1241_v17  ;;  %v414_v27 = vsel %vm413_vm6, %v408_v14, %v1240_v18  ;;  %v793_v14 = vrot.slane %v789_v12, %v1716_v2  ;;  %vm1828_vm8 = vcmp.eq.s32.totalorder %v781_v15, 1 }
 0x176   : > { %v1244_v19 = vpop.permute.xlu1 %1243  ;;  %v535_v20 = vpop.permute.xlu0 %534 }
 0x177   : > { %v1246_v21 = vunpack.i.h.bf16 %v1244_v19  ;;  %v1245_v23 = vunpack.i.l.bf16 %v1244_v19 }
 0x179   : > { %v453_v22 = vsel %vm451_vm7, %v1245_v23, %v1246_v21  ;;  %v452_v28 = vsel %vm451_vm7, %v446_v13, %v1245_v23  ;;  %v777_v13 = vrot.slane %v773_v11, %v1716_v2  ;;  %vm1824_vm7 = vcmp.eq.s32.totalorder %v793_v14, 1 }
 0x17a   : > { %v1249_v29 = vpop.permute.xlu1 %1248  ;;  %v1259_v30 = vpop.permute.xlu0 %1258  ;;  %v1099_v31 = vpack.c.bf16 %v453_v22, %v415_v26  ;;  %v1101_v32 = vpack.c.bf16 %v452_v28, %v414_v27  ;;  %v902_v26 = vld [vmem:[%s1707_s13] sm:$0xff] }
 0x17b   : > { %v1251_v33 = vunpack.i.h.bf16 %v1249_v29  ;;  %v1250_v34 = vunpack.i.l.bf16 %v1249_v29  ;;  %v1261_v35 = vunpack.i.h.bf16 %v1259_v30  ;;  %v1260_v36 = vunpack.i.l.bf16 %v1259_v30 }
 0x17c   : > { %1100 = vmatprep.subr.bf16.mxu0 %v1099_v31  ;;  %1118 = vmatprep.subr.bf16.mxu1 %v1099_v31  ;;  %vm1820_vm6 = vcmp.eq.s32.totalorder %v777_v13, 1  ;;  %v837_v29 = vsel %vm836_vm5, 1, %v1468_v10 }
 0x17d   : > { %1102 = vmatpush1.bf16.msra.mxu0 %v1101_v32  ;;  %1123 = vmatpush1.bf16.msra.mxu1 %v1101_v32  ;;  %v504_v39 = vsel %vm502_vm9, %v1250_v34, %v1251_v33  ;;  %v503_v40 = vsel %vm502_vm9, %v497_v16, %v1250_v34  ;;  %v542_v45 = vsel %vm540_vm10, %v1260_v36, %v1261_v35 }
 0x17e   : > { %v1254_v41 = vpop.permute.xlu1 %1253  ;;  %v1103_v42 = vpack.c.bf16 %v504_v39, %v466_v37  ;;  %v1105_v43 = vpack.c.bf16 %v503_v40, %v465_v38  ;;  %v1264_v44 = vpop.permute.xlu0 %1263  ;;  %v541_v54 = vsel %vm540_vm10, %v535_v20, %v1260_v36  ;;  %v797_v16 = vrot.slane %v789_v12, %v1719_v3 }
 0x17f   : > { %v1256_v46 = vunpack.i.h.bf16 %v1254_v41  ;;  %v1255_v47 = vunpack.i.l.bf16 %v1254_v41  ;;  %v1266_v48 = vunpack.i.h.bf16 %v1264_v44  ;;  %v1265_v49 = vunpack.i.l.bf16 %v1264_v44 }
 0x180   : > { %1104 = vmatprep.subr.bf16.mxu0 %v1103_v42  ;;  %1119 = vmatprep.subr.bf16.mxu1 %v1103_v42  ;;  %vm1832_vm9 = vcmp.eq.s32.totalorder %v797_v16, 1  ;;  %v825_v35 = vrot.slane %v821_v25, %v1716_v2  ;;  %v841_v44 = vrot.slane %v837_v29, %v1716_v2 }
 0x181   : > { %1106 = vmatpush1.bf16.msra.mxu0 %v1105_v43  ;;  %1124 = vmatpush1.bf16.msra.mxu1 %v1105_v43  ;;  %v555_v50 = vsel %vm553_vm11, %v1255_v47, %v1256_v46  ;;  %v593_v51 = vsel %vm591_vm12, %v1265_v49, %v1266_v48  ;;  %v829_v43 = vrot.slane %v821_v25, %v1719_v3 }
 0x182   : > { %v548_v52 = vpop.permute.xlu1 %547  ;;  %v1107_v53 = vpack.c.bf16 %v555_v50, %v542_v45  ;;  %v1111_v57 = vpack.c.bf16 %v1466_v56, %v593_v51  ;;  %v845_v48 = vrot.slane %v837_v29, %v1719_v3  ;;  %vm1871_vm1 = vcmp.eq.s32.totalorder %v841_v44, 1 }
 0x183   : > { %v554_v55 = vsel %vm553_vm11, %v548_v52, %v1255_v47  ;;  %vm852_vm11 = vcmp.eq.s32.totalorder %v771_v9, 5  ;;  %v885_v52 = vsel %vm884_vm13, 1, %v1468_v10 }
 0x184   : > { %v1109_v58 = vpack.c.bf16 %v554_v55, %v541_v54  ;;  %1108 = vmatprep.subr.bf16.mxu0 %v1107_v53  ;;  %1120 = vmatprep.subr.bf16.mxu1 %v1107_v53  ;;  %v853_v42 = vsel %vm852_vm11, 1, %v1468_v10  ;;  %vm1877_vm2 = vcmp.eq.s32.totalorder %v845_v48, 1 }
 0x185   : > { %v857_v55 = vrot.slane %v853_v42, %v1716_v2 }
 0x186   : > { %v586_v59 = vpop.permute.xlu1 %585  ;;  %1110 = vmatpush1.bf16.msra.mxu0 %v1109_v58  ;;  %1125 = vmatpush1.bf16.msra.mxu1 %v1109_v58  ;;  %v861_v58 = vrot.slane %v853_v42, %v1719_v3 }
 0x187   : > { %v592_v60 = vsel %vm591_vm12, %v586_v59, %v1265_v49  ;;  %1113 = vmatprep.subr.msk.bf16.mxu0 %vm1112_vm15, %v1111_v57  ;;  %1121 = vmatprep.subr.msk.bf16.mxu1 %vm1112_vm15, %v1111_v57  ;;  %vm868_vm12 = vcmp.eq.s32.totalorder %v771_v9, 6  ;;  %v893_v9 = vrot.slane %v885_v52, %v1719_v3 }
 0x188   : > { %v1114_v1 = vpack.c.bf16 %v1466_v56, %v592_v60  ;;  %v869_v50 = vsel %vm868_vm12, 1, %v1468_v10  ;;  %vm863_vm4 = vcmp.eq.s32.totalorder %v861_v58, 1 }
 0x18a   : > { %1116 = vmatpush1.bf16.msk.msra.mxu0 %vm1112_vm15, %v1114_v1  ;;  %1126 = vmatpush1.bf16.msk.msra.mxu1 %vm1112_vm15, %v1114_v1  ;;  %vm1862_vm15 = vcmp.eq.s32.totalorder %v825_v35, 1 }
 0x18d   : > { %1078 = vmatmul.mubr.msk.f32.vlgmr.msra.gmra.mrb[0].mxu0 %vm633_vm0, %v605_v61  ;;  %1082 = vmatmul.mubr.msk.f32.vlgmr.msra.gmra.mrb[0].mxu1 %vm633_vm0, %v609_v62  ;;  %v873_v61 = vrot.slane %v869_v50, %v1716_v2 }
 0x18e   : > { %728 = vmatprep.mubr.f32.mxu0 %v1463_v5  ;;  %752 = vmatprep.mubr.f32.mxu1 %v1463_v5 }
 0x18f   : > { %vm878_vm5 = vcmp.eq.s32.totalorder %v873_v61, 1 }
 0x191   : > { %1079 = vmatmul.mubr.msk.f32.gmra.mrb[2].mxu0 %vm633_vm0, %v606_v63  ;;  %1083 = vmatmul.mubr.msk.f32.gmra.mrb[2].mxu1 %vm633_vm0, %v610_v0  ;;  %v889_v63 = vrot.slane %v885_v52, %v1716_v2 }
 0x192   : > { %734 = vmatprep.mubr.f32.mxu0 %v1463_v5  ;;  %758 = vmatprep.mubr.f32.mxu1 %v1463_v5 }
 0x195   : > { %1080 = vmatmul.mubr.msk.f32.gmra.mrb[4].mxu0 %vm633_vm0, %v607_v4  ;;  %1084 = vmatmul.mubr.msk.f32.gmra.mrb[4].mxu1 %vm633_vm0, %v611_v6 }
 0x196   : > { %740 = vmatprep.mubr.f32.mxu0 %v1463_v5  ;;  %764 = vmatprep.mubr.f32.mxu1 %v1463_v5  ;;  %v805_v5 = vsel %vm804_vm3, 1, %v1468_v10  ;;  %vm862_vm3 = vcmp.eq.s32.totalorder %v857_v55, 1 }
 0x197   : > { %v809_v19 = vrot.slane %v805_v5, %v1716_v2  ;;  %v813_v27 = vrot.slane %v805_v5, %v1719_v3 }
 0x199   : > { %1081 = vmatmul.mubr.msk.f32.gmra.mrb[6].mxu0 %vm633_vm0, %v608_v7  ;;  %1085 = vmatmul.mubr.msk.f32.gmra.mrb[6].mxu1 %vm633_vm0, %v612_v8  ;;  %vm1837_vm10 = vcmp.eq.s32.totalorder %v809_v19, 1  ;;  %vm1850_vm14 = vcmp.eq.s32.totalorder %v813_v27, 1  ;;  %vm1867_vm0 = vcmp.eq.s32.totalorder %v829_v43, 1  ;;  %v877_v7 = vrot.slane %v869_v50, %v1719_v3 }
 0x260   : > { %v724_v17 = vpop.f32.mrb[0].mxu0  ;;  %v1815_v18 = vpop.f32.mrb[0].mxu1 }
 0x261   : > { %v726_v20 = vpop.f32.mrb[1].mxu0  ;;  %v1818_v21 = vpop.f32.mrb[1].mxu1  ;;  %v784_v32 = vsel %vm1820_vm6, %v724_v17, 0.0  ;;  %v848_v2 = vsel %vm1871_vm1, %v1815_v18, 0.0  ;;  %vm894_vm6 = vcmp.eq.s32.totalorder %v889_v63, 1 }
 0x262   : > { %v785_v37 = vsel %vm1828_vm8, %v726_v20, 0.0  ;;  %v849_v5 = vsel %vm1877_vm2, %v1818_v21, 0.0  ;;  %vm895_vm8 = vcmp.eq.s32.totalorder %v893_v9, 1 }
 0x264   : > { %v730_v28 = vpop.f32.mrb[2].mxu0  ;;  %v754_v31 = vpop.f32.mrb[2].mxu1 }
 0x265   : > { %v800_v33 = vsel %vm1824_vm7, %v730_v28, 0.0  ;;  %v732_v34 = vpop.f32.mrb[3].mxu0  ;;  %v756_v36 = vpop.f32.mrb[3].mxu1  ;;  %v864_v3 = vsel %vm862_vm3, %v754_v31, 0.0  ;;  %vm879_vm7 = vcmp.eq.s32.totalorder %v877_v7, 1  ;;  %v903_v28 = vld [vmem:[%s1707_s13 + $0x8] sm:$0xff] }
 0x266   : > { %v802_v38 = vadd.f32 %v800_v33, %v784_v32  ;;  %v801_v39 = vsel %vm1832_vm9, %v732_v34, 0.0  ;;  %v865_v15 = vsel %vm863_vm4, %v756_v36, 0.0  ;;  %s909_s13 = scalar_lea.sflag [#allocation5], %s1691_s30 }
 0x267   : > { %v803_v40 = vadd.f32 %v801_v39, %v785_v37 }
 0x268   : > { %v736_v45 = vpop.f32.mrb[4].mxu0  ;;  %v760_v46 = vpop.f32.mrb[4].mxu1 }
 0x269   : > { %v816_v47 = vsel %vm1837_vm10, %v736_v45, 0.0  ;;  %v738_v49 = vpop.f32.mrb[5].mxu0  ;;  %v762_v51 = vpop.f32.mrb[5].mxu1  ;;  %v880_v17 = vsel %vm878_vm5, %v760_v46, 0.0 }
 0x26a   : > { %v818_v53 = vadd.f32 %v816_v47, %v802_v38  ;;  %v817_v54 = vsel %vm1850_vm14, %v738_v49, 0.0  ;;  %v881_v23 = vsel %vm879_vm7, %v762_v51, 0.0 }
 0x26b   : > { %v819_v57 = vadd.f32 %v817_v54, %v803_v40 }
 0x26c   : > { %v742_v1 = vpop.f32.mrb[6].mxu0  ;;  %v766_v62 = vpop.f32.mrb[6].mxu1 }
 0x26d   : > { %v832_v4 = vsel %vm1862_vm15, %v742_v1, 0.0  ;;  %v744_v6 = vpop.f32.mrb[7].mxu0  ;;  %v768_v8 = vpop.f32.mrb[7].mxu1  ;;  %v896_v19 = vsel %vm894_vm6, %v766_v62, 0.0 }
 0x26e   : > { %v834_v10 = vadd.f32 %v832_v4, %v818_v53  ;;  %v833_v11 = vsel %vm1867_vm0, %v744_v6, 0.0  ;;  %v897_v24 = vsel %vm895_vm8, %v768_v8, 0.0 }
 0x26f   : > { %v835_v12 = vadd.f32 %v833_v11, %v819_v57 }
 0x270   : > { %v850_v13 = vadd.f32 %v848_v2, %v834_v10 }
 0x271   : > { %v851_v14 = vadd.f32 %v849_v5, %v835_v12 }
 0x272   : > { %v866_v16 = vadd.f32 %v864_v3, %v850_v13 }
 0x273   : > { %v867_v18 = vadd.f32 %v865_v15, %v851_v14 }
 0x274   : > { %v882_v20 = vadd.f32 %v880_v17, %v866_v16 }
 0x275   : > { %v883_v21 = vadd.f32 %v881_v23, %v867_v18 }
 0x276   : > { %v898_v25 = vadd.f32 %v896_v19, %v882_v20 }
 0x277   : > { %v899_v22 = vadd.f32 %v897_v24, %v883_v21 }
 0x278   : > { %v900_v27 = vmul.f32 0.1, %v898_v25 }
 0x279   : > { %v901_v29 = vmul.f32 0.1, %v899_v22 }
 0x27a   : > { %v904_v30 = vadd.f32 %v902_v26, %v900_v27 }
 0x27b   : > { %v905_v31 = vadd.f32 %v903_v28, %v901_v29 }
 0x27c   : > { %906 = vst [vmem:[%s335_s8] sm:$0xff] %v904_v30 }
 0x27d   : > { %907 = vst [vmem:[%s335_s8 + $0x8] sm:$0xff] %v905_v31 }
 0x27e   : > { %1368 = shalt.err (!%p1365_p10)
}
 0x27f   : > { %s1369_s30 = scalar_lea.hbm %s1901_s16, 256  ;;  %s1373_s17 = scalar_lea.hbm %s1955_s5, 512 }
 0x280   : > { %p1370_p13 = scmp.ne.s32.totalorder %s1901_s16, %s1369_s30  ;;  %p1374_p11 = scmp.lt.u32.totalorder %s1901_s16, %s1955_s5 }
 0x281   : > { %p1375_p2 = scmp.lt.u32.totalorder %s1373_s17, %s1369_s30  ;;  %p1377_p5 = scmp.lt.u32.totalorder %s1369_s30, %s1901_s16 }
 0x282   : > { %p1371_p7 = pnand %p1370_p13, %p2003_p1 }
 0x283   : > { %p1376_p4 = por %p1375_p2, %p1374_p11 }
 0x284   : > { %p1372_p3 = pneg %p1371_p7 }
 0x285   : > { %p1378_p12 = por %p1377_p5, %p1376_p4 }
 0x287   : > { %p1379_p0 = pnand %p1378_p12, %p1372_p3 }
 0x289   : > { %1382 = shalt.err (!%p1379_p0)
}
 0x28a   : > { %1138 = dma.vmem_to_hbm [thread:$0]  (%p2003_p1), %s1903_s15, 256, %s1901_s16, %s909_s13  }
 0x28b PF: > { %s937_s22 = sand.u32 1, %s1425_s18   ;;  %p2004_p9 = scmp.ne.s32.totalorder %s1973_s12, 0 }
 0x28c   : > { %p2005_p6 = scmp.ge.s32.totalorder %s1445_s23, 2  ;;  %s938_s24 = scalar_lea.sflag [#allocation5], %s937_s22 }
 0x28e   : > { %p1152_p8 = pnand %p2005_p6, %p2004_p9 }
 0x290   : > { %1420 = dma.done.wait (!%p1152_p8), %s938_s24, 256  }
 0x291   : > { %1422 = vsyncadd (!%p1152_p8), %s938_s24, 4294967040  ;;  %s22_s23 = sadd.s32 1, %s1445_s23   ;;  %s2006_s9 = sld [smem:[#allocation16_spill]] }
 0x292   : > { %p19_p10 = scmp.ge.s32.totalorder %s22_s23, 4   ;;  %s2007_s21 = sld [smem:[#allocation14_spill]] }
 0x293   : > { %s2008_s22 = sld [smem:[#allocation15_spill]]  ;;  %s2009_s18 = smov %s1429_s19 }
 0x294   : > { %s2010_s19 = smov %s1433_s20  ;;  %21 = sbr.rel (!%p19_p10) target bundleno = 9 (0x9), region = 104 }
 0x297   : > { %s2011_s20 = smov %s2006_s9 }
 0x29b   :  { %943 = vsyncpa [#allocation4], 1 }
 0x29c   :  { %945 = vsyncpa [#allocation4 + $0x1], 1 }
 0x29d   :  { %946 = vsyncpa [#allocation7], 1 }
 0x29e   :  { %947 = vsyncpa [#allocation5], 1 }
 0x29f   :  { %949 = vsyncpa [#allocation5 + $0x1], 1 }

</bundles_post_ra>
